<compile_context>
chip_gen: v5e
topology: v5e:2x2
jax: 0.10.0
libtpu: 0.0.40
codegen_flags: <defaults>
</compile_context>

<pallas_src>
import jax
import jax.numpy as jnp
from jax.experimental import pallas as pl
from jax.experimental.pallas import tpu as pltpu


# ----------------------------- kernels ------------------------------------ #

def _linear_kernel_inplace(x_ref, w_ref, o_ref):
    # x_ref: [tm, tk], w_ref: [tk, tn], o_ref: [tm, tn] (f32).
    # o_ref is resident across the K grid axis (same block index for all k).
    # Correctness requires K to be the innermost grid axis.
    @pl.when(pl.program_id(2) == 0)
    def _init():
        o_ref[...] = jnp.zeros_like(o_ref)

    o_ref[...] += jnp.dot(
        x_ref[...], w_ref[...], preferred_element_type=jnp.float32
    )


def _linear_kernel_acc(x_ref, w_ref, o_ref, acc_ref):
    # Same as above, but with an explicit f32 accumulator for non-f32 outputs.
    @pl.when(pl.program_id(2) == 0)
    def _init():
        acc_ref[...] = jnp.zeros_like(acc_ref)

    acc_ref[...] += jnp.dot(
        x_ref[...], w_ref[...], preferred_element_type=jnp.float32
    )

    @pl.when(pl.program_id(2) == pl.num_programs(2) - 1)
    def _writeback():
        o_ref[...] = acc_ref[...].astype(o_ref.dtype)


# --------------------------- tiling helpers -------------------------------- #

_TM_CAND = (512, 256, 128, 64, 32, 16, 8)
_TN_CAND = (512, 384, 256, 128)      # multiples of 128: lane-dense stores, MXU-aligned
_TK_CAND = (1024, 512, 256, 128)


def _round_up(v, m):
    return ((v + m - 1) // m) * m


def _pick(dim, cands):
    """Largest candidate that divides `dim` (dim is already 8/128 aligned)."""
    for t in cands:
        if t <= dim and dim % t == 0:
            return t
    return dim


def _shrink(t, dim, cands):
    for c in cands:
        if c < t and dim % c == 0:
            return c
    return t


def _tile_bytes(tm, tn, tk, in_itemsize, out_itemsize, use_scratch):
    b = 2 * (tm * tk + tk * tn) * in_itemsize   # double-buffered input tiles
    b += 2 * tm * tn * out_itemsize             # double-buffered output tile
    if use_scratch:
        b += tm * tn * 4                        # f32 accumulator
    return b


def _vmem_limit_bytes():
    # Budget against the actual chip generation (v7x: 64 MiB/TC); conservative
    # fallback if the query is unavailable. Cap at 64 MiB (safe everywhere).
    try:
        cap = pltpu.get_tpu_info().vmem_capacity_bytes
        return min(int(cap * 3 // 4), 64 * 1024 * 1024)
    except Exception:
        return 32 * 1024 * 1024


# ----------------------------- wrappers ------------------------------------ #

def prepare_weight(weight):
    """One-time prep of a PyTorch-layout weight [out_features, in_features].

    Returns a [Kp, Np] array (transposed + padded to 128-multiples).  Do this
    once at init for a static weight so no per-forward HBM pass is spent on it.
    """
    N, K = weight.shape
    Kp = _round_up(K, 128)
    Np = _round_up(N, 128)
    w_t = weight.T  # [K, N]: kernel does a plain (tm,tk)x(tk,tn) dot, no XLU transpose
    if (Kp, Np) != (K, N):
        w_t = jnp.zeros((Kp, Np), weight.dtype).at[:K, :N].set(w_t)
    return w_t


def linear_forward_prepared(x, w_prep, out_features,
                            *, tm_max=512, tn_max=512, tk_max=1024):
    """y = x @ W.T with W already prepared by prepare_weight().

    x:       [B, in_features]
    w_prep:  [Kp, Np]  (padded, transposed weight)
    returns  [B, out_features]
    """
    B, K = x.shape
    Kp, Np = w_prep.shape
    N = out_features
    assert Kp == _round_up(K, 128), "prepared weight K-dim mismatch"
    assert N <= Np, "prepared weight N-dim mismatch"

    in_itemsize = jnp.dtype(x.dtype).itemsize
    out_itemsize = in_itemsize
    sub = 8 * max(1, 4 // in_itemsize)        # sublane multiple: 8 f32 / 16 bf16
    Bp = _round_up(B, sub)

    # Pad x only when needed (skip the extra HBM pass for aligned shapes).
    if (Bp, Kp) != (B, K):
        x_p = jnp.zeros((Bp, Kp), x.dtype).at[:B, :K].set(x)
    else:
        x_p = x

    # Divisor tiles of the aligned dims -> zero over-padding of the problem.
    tm = _pick(Bp, tuple(t for t in _TM_CAND if t <= tm_max))
    tn = _pick(Np, tuple(t for t in _TN_CAND if t <= tn_max))
    tk = _pick(Kp, tuple(t for t in _TK_CAND if t <= tk_max))

    # v7x megacore: if both parallel axes collapsed to one block but N is wide,
    # split N so the second TensorCore has work.
    if Bp // tm == 1 and Np // tn == 1 and Np >= 256:
        tn = _pick(Np, tuple(t for t in _TN_CAND if t <= Np // 2))

    # Keep the double-buffered footprint inside the per-generation VMEM budget.
    vmem_limit = _vmem_limit_bytes()
    budget = vmem_limit - 4 * 1024 * 1024
    use_scratch = jnp.dtype(x.dtype) != jnp.dtype(jnp.float32)
    while _tile_bytes(tm, tn, tk, in_itemsize, out_itemsize, use_scratch) > budget:
        new_tk = _shrink(tk, Kp, _TK_CAND)
        if new_tk != tk:
            tk = new_tk
            continue
        new_tn = _shrink(tn, Np, _TN_CAND)
        if new_tn != tn:
            tn = new_tn
            continue
        new_tm = _shrink(tm, Bp, _TM_CAND)
        if new_tm != tm:
            tm = new_tm
            continue
        break

    # Grid: K must stay innermost (reduction over the resident output block).
    grid = (Bp // tm, Np // tn, Kp // tk)

    cost = pl.CostEstimate(
        flops=2 * Bp * Kp * Np,
        transcendentals=0,
        bytes_accessed=(Bp * Kp + Kp * Np + Bp * Np) * in_itemsize,
    )

    kernel = _linear_kernel_acc if use_scratch else _linear_kernel_inplace
    scratch = [pltpu.VMEM((tm, tn), jnp.float32)] if use_scratch else []

    out_p = pl.pallas_call(
        kernel,
        out_shape=jax.ShapeDtypeStruct((Bp, Np), x.dtype),
        grid_spec=pltpu.PrefetchScalarGridSpec(
            num_scalar_prefetch=0,
            grid=grid,
            in_specs=[
                pl.BlockSpec((tm, tk), lambda i, j, k: (i, k)),   # x tile
                pl.BlockSpec((tk, tn), lambda i, j, k: (k, j)),   # weight tile
            ],
            out_specs=pl.BlockSpec((tm, tn), lambda i, j, k: (i, j)),
            scratch_shapes=scratch,
        ),
        compiler_params=pltpu.CompilerParams(
            dimension_semantics=("parallel", "parallel", "arbitrary"),
            vmem_limit_bytes=vmem_limit,
        ),
        cost_estimate=cost,
    )(x_p, w_prep)

    if (Bp, Np) != (B, N):
        out_p = out_p[:B, :N]
    return out_p


def linear_regression_forward(x, weight, **tile_kwargs):
    """Forward of nn.Linear(input_size, output_size, bias=False).

    x:      [B, input_size]
    weight: [output_size, input_size]  (PyTorch layout)
    For repeated forwards with a static weight, call prepare_weight() once and
    use linear_forward_prepared() directly (skips the per-call weight prep).
    """
    w_prep = prepare_weight(weight)
    return linear_forward_prepared(x, w_prep, weight.shape[0], **tile_kwargs)


if __name__ == "__main__":
    # Small shapes consistent with the module's forward.
    input_size = 32
    output_size = 16
    batch = 8

    key = jax.random.PRNGKey(0)
    kx, kw = jax.random.split(key)

    x = jax.random.normal(kx, (batch, input_size), dtype=jnp.float32)
    # nn.Linear weight shape: [output_size, input_size]
    weight = jax.random.normal(kw, (output_size, input_size), dtype=jnp.float32) * 0.1

    # Hoist the weight prep out of the hot path (done once).
    w_prep = prepare_weight(weight)

    out = linear_forward_prepared(x, w_prep, output_size)
    jax.block_until_ready(out)

    # `out.to(self.device)` in the torch module is a device-placement no-op here.
    ref = x @ weight.T
    assert out.shape == (batch, output_size)
    assert jnp.allclose(out, ref, atol=1e-4, rtol=1e-4)

    print("KERNEL_OK")
</pallas_src>

<mosaic_0001>
module attributes {stable_mosaic.version = 11 : i64} {
  func.func @_linear_kernel_inplace(%arg0: i32, %arg1: i32, %arg2: i32, %arg3: memref<8x128xf32, #tpu.memory_space<vmem>>, %arg4: memref<128x128xf32, #tpu.memory_space<vmem>>, %arg5: memref<8x128xf32, #tpu.memory_space<vmem>>) attributes {dimension_semantics = [#tpu.dimension_semantics<parallel>, #tpu.dimension_semantics<parallel>, #tpu.dimension_semantics<arbitrary>], iteration_bounds = array<i64: 1, 1, 1>, scalar_prefetch = 0 : i64, scratch_operands = 0 : i64, tpu.core_type = #tpu.core_type<tc>, window_params = [{transform_indices = @transform_0, window_bounds = array<i64: 8, 128>}, {transform_indices = @transform_1, window_bounds = array<i64: 128, 128>}, {transform_indices = @transform_2, window_bounds = array<i64: 8, 128>}]} {
    %c0_i32 = arith.constant 0 : i32
    %0 = arith.cmpi eq, %arg2, %c0_i32 : i32
    %1 = arith.extui %0 : i1 to i32
    %c0_i32_0 = arith.constant 0 : i32
    %2 = arith.cmpi ne, %1, %c0_i32_0 : i32
    scf.if %2 {
      %cst_8 = arith.constant 0.000000e+00 : f32
      %9 = vector.broadcast %cst_8 : f32 to vector<8x128xf32>
      %c0_9 = arith.constant 0 : index
      %c0_10 = arith.constant 0 : index
      %10 = vector.load %arg5[%c0_9, %c0_10] : memref<8x128xf32, #tpu.memory_space<vmem>>, vector<8x128xf32>
      tpu.vector_store %arg5[%c0_9, %c0_10], %9 {strides = array<i32>} : memref<8x128xf32, #tpu.memory_space<vmem>>, vector<8x128xf32>,
    } else {
    }
    %c0 = arith.constant 0 : index
    %c0_1 = arith.constant 0 : index
    %3 = vector.load %arg5[%c0, %c0_1] : memref<8x128xf32, #tpu.memory_space<vmem>>, vector<8x128xf32>
    %c0_2 = arith.constant 0 : index
    %c0_3 = arith.constant 0 : index
    %4 = vector.load %arg3[%c0_2, %c0_3] : memref<8x128xf32, #tpu.memory_space<vmem>>, vector<8x128xf32>
    %c0_4 = arith.constant 0 : index
    %c0_5 = arith.constant 0 : index
    %5 = vector.load %arg4[%c0_4, %c0_5] : memref<128x128xf32, #tpu.memory_space<vmem>>, vector<128x128xf32>
    %cst = arith.constant dense<0.000000e+00> : vector<8x128xf32>
    %6 = tpu.matmul %4, %5, %cst {dimension_numbers = #tpu.dot_dimension_numbers<[1], [0], [0], [1], [0, 0, 1, 1], [], []>} : vector<8x128xf32>, vector<128x128xf32>, vector<8x128xf32> -> vector<8x128xf32>
    %7 = arith.addf %3, %6 : vector<8x128xf32>
    %c0_6 = arith.constant 0 : index
    %c0_7 = arith.constant 0 : index
    %8 = vector.load %arg5[%c0_6, %c0_7] : memref<8x128xf32, #tpu.memory_space<vmem>>, vector<8x128xf32>
    tpu.vector_store %arg5[%c0_6, %c0_7], %7 {strides = array<i32>} : memref<8x128xf32, #tpu.memory_space<vmem>>, vector<8x128xf32>,
    return
  }
  func.func @transform_0(%arg0: i32, %arg1: i32, %arg2: i32) -> (i32, i32) {
    %c0_i32 = arith.constant 0 : i32
    return %arg0, %arg2 : i32, i32
  }
  func.func @transform_1(%arg0: i32, %arg1: i32, %arg2: i32) -> (i32, i32) {
    %c0_i32 = arith.constant 0 : i32
    return %arg2, %arg1 : i32, i32
  }
  func.func @transform_2(%arg0: i32, %arg1: i32, %arg2: i32) -> (i32, i32) {
    %c0_i32 = arith.constant 0 : i32
    return %arg0, %arg1 : i32, i32
  }
}

</mosaic_0001>

<bundles_post_ra>
// kernel: tpu_custom_call.1
= control target key start
LH: loop header
LB: loop body
LE: loop exit
PB: predicated region body
PF: predicated region fallthrough
CT: control target
= control target key end

     0   :  { %7 = vsyncpa [#allocation3], 0  ;;  %s218_s0 = inlined_call_operand.hbm [shape: f32[8,128], index: 0, kind: input, shape index: {}]   ;;  %s219_s1 = inlined_call_operand.hbm [shape: f32[128,128], index: 1, kind: input, shape index: {}]   ;;  %s220_s2 = inlined_call_operand.hbm [shape: f32[8,128], index: 2, kind: output, shape index: {}]  }
   0x1   :  { %8 = vsyncpa [#allocation6], 0 }
   0x2   :  { %9 = vsyncpa [#allocation4], 0  ;;  %s15_s11 = sshll.u32 %s218_s0, 4  ;;  %s189_s12 = smov [#allocation2]   ;;  %s16_s11 = int_to_ptr.hbm [resolvable:$true] %s15_s11 }
   0x3   :  { %s17_s13 = sshll.u32 %s189_s12, 4  ;;  %s25_s16 = sshll.u32 %s219_s1, 4  ;;  %s18_s13 = int_to_ptr.vmem [resolvable:$true] %s17_s13  ;;  %s26_s16 = int_to_ptr.hbm [resolvable:$true] %s25_s16 }
   0x4   :  { %20 = dma.hbm_to_vmem [thread:$0]  %s16_s11, 128, %s18_s13, [#allocation3]  }
   0x5   :  { %s190_s17 = smov [#allocation5]   ;;  %s191_s19 = smov 128  }
   0x6   :  { %s27_s18 = sshll.u32 %s190_s17, 4  ;;  %s192_s20 = smov 8   ;;  %s28_s18 = int_to_ptr.vmem [resolvable:$true] %s27_s18 }
   0x7   :  { %33 = dma.hbm_to_vmem [thread:$0]  %s26_s16, 2048, %s28_s18, [#allocation6], %s191_s19, %s191_s19, %s192_s20  }
   0x8   :  { %183 = dma.done.wait [#allocation3], 128  }
   0x9   :  { %184 = vsyncadd [#allocation3], 4294967168 }
   0xa   :  { %185 = dma.done.wait [#allocation6], 2048  }
   0xb   :  { %186 = vsyncadd [#allocation6], 4294965248  ;;  %v64_v0 = vld [vmem:[#allocation5 + $0x78] sm:$0xff]  ;;  %v63_v1 = vld [vmem:[#allocation5 + $0x70] sm:$0xff]  ;;  %s193_s0 = smov [#allocation7]   ;;  %s94_s23 = sshll.u32 %s220_s2, 4  ;;  %s95_s23 = int_to_ptr.hbm [resolvable:$true] %s94_s23 }
   0xc   :  { %65 = vmatpush.msra.mxu0 %v64_v0  ;;  %v62_v2 = vld [vmem:[#allocation5 + $0x68] sm:$0xff]  ;;  %v61_v3 = vld [vmem:[#allocation5 + $0x60] sm:$0xff]  ;;  %v60_v4 = vld [vmem:[#allocation5 + $0x58] sm:$0xff]  ;;  %s92_s1 = sshll.u32 %s193_s0, 4  ;;  %s93_s1 = int_to_ptr.vmem [resolvable:$true] %s92_s1 }
   0xd   :  { %v59_v5 = vld [vmem:[#allocation5 + $0x50] sm:$0xff]  ;;  %v58_v6 = vld [vmem:[#allocation5 + $0x48] sm:$0xff]  ;;  %v57_v7 = vld [vmem:[#allocation5 + $0x40] sm:$0xff] }
   0xe   :  { %66 = vmatpush.msra.mxu0 %v63_v1  ;;  %v56_v8 = vld [vmem:[#allocation5 + $0x38] sm:$0xff]  ;;  %v55_v9 = vld [vmem:[#allocation5 + $0x30] sm:$0xff]  ;;  %v54_v10 = vld [vmem:[#allocation5 + $0x28] sm:$0xff] }
   0xf   :  { %v53_v11 = vld [vmem:[#allocation5 + $0x20] sm:$0xff]  ;;  %v52_v12 = vld [vmem:[#allocation5 + $0x18] sm:$0xff]  ;;  %v51_v13 = vld [vmem:[#allocation5 + $0x10] sm:$0xff] }
  0x10   :  { %67 = vmatpush.msra.mxu0 %v62_v2  ;;  %v50_v14 = vld [vmem:[#allocation5 + $0x8] sm:$0xff]  ;;  %v49_v15 = vld [vmem:[#allocation5] sm:$0xff]  ;;  %v48_v16 = vld [vmem:[#allocation2] sm:$0xff] }
  0x12   :  { %68 = vmatpush.msra.mxu0 %v61_v3 }
  0x14   :  { %69 = vmatpush.msra.mxu0 %v60_v4 }
  0x16   :  { %70 = vmatpush.msra.mxu0 %v59_v5 }
  0x18   :  { %71 = vmatpush.msra.mxu0 %v58_v6 }
  0x1a   :  { %72 = vmatpush.msra.mxu0 %v57_v7 }
  0x1c   :  { %73 = vmatpush.msra.mxu0 %v56_v8 }
  0x1e   :  { %74 = vmatpush.msra.mxu0 %v55_v9 }
  0x20   :  { %75 = vmatpush.msra.mxu0 %v54_v10 }
  0x22   :  { %76 = vmatpush.msra.mxu0 %v53_v11 }
  0x24   :  { %77 = vmatpush.msra.mxu0 %v52_v12 }
  0x26   :  { %78 = vmatpush.msra.mxu0 %v51_v13 }
  0x28   :  { %79 = vmatpush.msra.mxu0 %v50_v14 }
  0x2a   :  { %80 = vmatpush.msra.mxu0 %v49_v15 }
  0x2b   :  { %81 = vmatmul.f32.vlgmr.msra.gmra.mxu0 %v48_v16 }
  0xa8   :  { %v82_v17 = vpop.f32.mrf.mxu0 }
  0xa9   :  { %86 = vst [vmem:[#allocation7] sm:$0xff] %v82_v17 }
  0xaa   :  { %97 = dma.vmem_to_hbm [thread:$0]  %s93_s1, 128, %s95_s23, [#allocation4]  }
  0xab   :  { %187 = dma.done.wait [#allocation4], 128  }
  0xac   :  { %188 = vsyncadd [#allocation4], 4294967168 }
  0xad   :  { %102 = vsyncpa [#allocation3], 1 }
  0xae   :  { %103 = vsyncpa [#allocation6], 1 }
  0xaf   :  { %104 = vsyncpa [#allocation4], 1 }

</bundles_post_ra>
